<compile_context>
chip_gen: v7x
topology: tpu7x:2x2x1
jax: 0.10.0
libtpu: 0.0.40
codegen_flags: <defaults>
</compile_context>

<pallas_src>
import functools
import math

import jax
import jax.numpy as jnp
from jax.experimental import pallas as pl
from jax.experimental.pallas import tpu as pltpu

KERNEL_SIZE = 3                       # matches ECAAttention(kernel_size=3)
_PAD = (KERNEL_SIZE - 1) // 2
_LANE = 128
_TWO_PASS_MIN_BYTES = 4 << 20         # reroute only big single-step inputs


def _cdiv(a, b):
    return -(-a // b)


def _round_up(x, m):
    return _cdiv(x, m) * m


def _sublane(itemsize):
    # Per-dtype sublane tile: 8 (f32) / 16 (bf16) / 32 (int8, fp8).
    return max(8, 32 // itemsize)


def _vmem_capacity_bytes():
    try:
        info = pltpu.get_tpu_info()
        cap = getattr(info, "vmem_capacity_bytes", None)
        if cap:
            return int(cap)
    except Exception:
        pass
    return 64 << 20                   # conservative default (v7x physical VMEM)


def _vmem_budgets(vmem_cap):
    """(tile_budget, vmem_limit): generation-aware scoped-VMEM settings."""
    vmem_limit = min((vmem_cap * 3) // 4, 96 << 20)   # 96 MiB v5e/v6e, 48 MiB v7x
    tile_budget = (vmem_limit * 2) // 3               # dbl-buffered in+out tiles
    return tile_budget, vmem_limit


# ----------------------------------------------------------------------------
# Kernels
# ----------------------------------------------------------------------------
def _eca_fused_kernel(w_ref, b_ref, x_ref, o_ref, *, channels):
    """Fused GAP -> conv1d(k=3, zero pad) -> sigmoid -> broadcast multiply.

    w_ref : SMEM (KERNEL_SIZE,) f32   conv weight
    b_ref : SMEM (1,) f32             conv bias
    x_ref : VMEM (rows_blk, HW)       rows are packed (batch, channel) pairs
    o_ref : VMEM (rows_blk, HW)
    Block row-starts are multiples of `channels`, so a row's channel
    neighbours are rows r-1 / r+1 of the same block; cross-batch leakage
    (and the conv's zero padding) is removed with per-row channel masks.
    """
    rows, hw = x_ref.shape

    # Global average pool over the flattened spatial (lane) axis, f32 accum.
    gap = jnp.sum(x_ref[...].astype(jnp.float32), axis=1, keepdims=True) * (1.0 / hw)

    # 3-tap conv along the channel (row) axis on the tiny (rows, 1) column.
    c_idx = jax.lax.broadcasted_iota(jnp.int32, (rows, 1), 0) % channels
    zpad = jnp.zeros((_PAD, 1), dtype=jnp.float32)
    padded = jnp.concatenate([zpad, gap, zpad], axis=0)          # (rows+2*_PAD, 1)
    acc = jnp.full((rows, 1), b_ref[0], dtype=jnp.float32)
    for k in range(KERNEL_SIZE):                                 # static unroll
        off = k - _PAD
        tap = padded[k:k + rows, :]                              # gap[r + off]
        valid = (c_idx + off >= 0) & (c_idx + off < channels)
        acc = acc + w_ref[k] * jnp.where(valid, tap, 0.0)
    y = jax.nn.sigmoid(acc)                                      # (rows, 1) f32

    # Multiply in f32 (matches the reference; VPU widens bf16 on v5e anyway),
    # cast only on the store.  Re-index x_ref rather than keeping the big
    # tile live across the reduction / EUP chain.
    o_ref[...] = (x_ref[...].astype(jnp.float32) * y).astype(o_ref.dtype)


def _eca_scale_kernel(y_ref, x_ref, o_ref):
    """Broadcast-multiply only (two-pass fallback).  y_ref: (rows_blk, 1) f32."""
    o_ref[...] = (x_ref[...].astype(jnp.float32) * y_ref[...]).astype(o_ref.dtype)


# ----------------------------------------------------------------------------
# Planning + pallas_call wrappers
# ----------------------------------------------------------------------------
def _plan_fused(rows, channels, hw, itemsize, budget):
    """Row-block size for the fused kernel, or None if even one block of
    lcm(C, sublane) rows cannot fit the double-buffered VMEM budget."""
    sub = _sublane(itemsize)
    hw_pad = _round_up(hw, _LANE)
    unit = (channels * sub) // math.gcd(channels, sub)      # lcm(C, sublane)

    def blk_bytes(rblk):   # in + out tiles, double-buffered, physical padding
        return 4 * _round_up(rblk, sub) * hw_pad * itemsize

    if rows <= unit:
        return rows if blk_bytes(rows) <= budget else None
    if blk_bytes(unit) > budget:
        return None
    units_total = _cdiv(rows, unit)
    units_fit = max(1, budget // blk_bytes(unit))
    # >= 2 grid steps so both v7x TensorCores get work (near-free on 1-TC chips).
    units_per_blk = min(units_fit, _cdiv(units_total, 2))
    return units_per_blk * unit


def _fused_call(x2, w, b, channels, rows_blk, vmem_limit):
    rows, hw = x2.shape
    itemsize = int(jnp.dtype(x2.dtype).itemsize)
    grid = (_cdiv(rows, rows_blk),)
    cost = pl.CostEstimate(
        flops=3 * rows * hw + 10 * rows,
        transcendentals=rows,
        bytes_accessed=2 * rows * hw * itemsize,
    )
    return pl.pallas_call(
        functools.partial(_eca_fused_kernel, channels=channels),
        out_shape=jax.ShapeDtypeStruct((rows, hw), x2.dtype),
        grid_spec=pltpu.PrefetchScalarGridSpec(
            num_scalar_prefetch=0,
            grid=grid,
            in_specs=[
                pl.BlockSpec(memory_space=pltpu.SMEM),             # conv weight
                pl.BlockSpec(memory_space=pltpu.SMEM),             # conv bias
                pl.BlockSpec((rows_blk, hw), lambda r: (r, 0)),    # x rows slab
            ],
            out_specs=pl.BlockSpec((rows_blk, hw), lambda r: (r, 0)),
        ),
        compiler_params=pltpu.CompilerParams(
            dimension_semantics=("parallel",),
            vmem_limit_bytes=vmem_limit,
        ),
        cost_estimate=cost,
    )(w, b, x2)


def _plan_scale(rows, hw, itemsize, budget):
    sub = _sublane(itemsize)
    hw_pad = _round_up(hw, _LANE)
    strip = 4 * sub * hw_pad * itemsize            # one sublane strip, dbl-buf io
    if strip <= budget:
        hw_blk = hw
        row_blk = min(rows, max(1, budget // strip) * sub)
        if row_blk >= rows and rows > sub:         # keep >=2 parallel steps
            row_blk = min(rows, _round_up(_cdiv(rows, 2), sub))
    else:
        row_blk = min(rows, sub)
        lanes = max(1, budget // (4 * _round_up(row_blk, sub) * itemsize * _LANE))
        hw_blk = min(lanes * _LANE, hw_pad)
        if hw_blk >= hw:
            hw_blk = hw
    return row_blk, hw_blk


def _scale_call(x2, y_col, row_blk, hw_blk, vmem_limit):
    rows, hw = x2.shape
    itemsize = int(jnp.dtype(x2.dtype).itemsize)
    grid = (_cdiv(rows, row_blk), _cdiv(hw, hw_blk))
    cost = pl.CostEstimate(
        flops=rows * hw,
        transcendentals=0,
        bytes_accessed=2 * rows * hw * itemsize + rows * 4,
    )
    return pl.pallas_call(
        _eca_scale_kernel,
        out_shape=jax.ShapeDtypeStruct((rows, hw), x2.dtype),
        grid_spec=pltpu.PrefetchScalarGridSpec(
            num_scalar_prefetch=0,
            grid=grid,
            in_specs=[
                pl.BlockSpec((row_blk, 1), lambda r, h: (r, 0)),        # y column
                pl.BlockSpec((row_blk, hw_blk), lambda r, h: (r, h)),   # x tile
            ],
            out_specs=pl.BlockSpec((row_blk, hw_blk), lambda r, h: (r, h)),
        ),
        compiler_params=pltpu.CompilerParams(
            dimension_semantics=("parallel", "parallel"),
            vmem_limit_bytes=vmem_limit,
        ),
        cost_estimate=cost,
    )(y_col, x2)


def _two_pass(x2, w, b, batch, channels, tile_budget, vmem_limit):
    """Fallback for slabs too big to fuse: y in XLA, tiled multiply in Pallas."""
    rows, hw = x2.shape
    itemsize = int(jnp.dtype(x2.dtype).itemsize)
    gap = jnp.mean(x2, axis=1, dtype=jnp.float32).reshape(batch, channels)
    padded = jnp.pad(gap, ((0, 0), (_PAD, _PAD)))
    y = b[0]
    for k in range(KERNEL_SIZE):
        y = y + w[k] * padded[:, k:k + channels]
    y = jax.nn.sigmoid(y).reshape(rows, 1)                      # (B*C, 1) f32
    row_blk, hw_blk = _plan_scale(rows, hw, itemsize, tile_budget)
    return _scale_call(x2, y, row_blk, hw_blk, vmem_limit)


# ----------------------------------------------------------------------------
# Public entry point + reference
# ----------------------------------------------------------------------------
def eca_attention(x, conv_w, conv_b):
    """x: (B, C, H, W) f32/bf16; conv_w: KERNEL_SIZE weights; conv_b: 1 bias."""
    B, C, H, W = x.shape
    hw = H * W
    rows = B * C
    itemsize = int(jnp.dtype(x.dtype).itemsize)

    vmem_cap = _vmem_capacity_bytes()
    tile_budget, vmem_limit = _vmem_budgets(vmem_cap)

    x2 = x.reshape(rows, hw)
    w = conv_w.reshape(-1).astype(jnp.float32)
    b = conv_b.reshape(-1).astype(jnp.float32)

    rows_blk = _plan_fused(rows, C, hw, itemsize, tile_budget)

    # On 64 MiB-VMEM chips (v7x, 2 TensorCores) a large input that only gets a
    # single fused grid step would idle one core; the tiled two-pass multiply
    # keeps both cores busy at the HBM roofline instead.
    small_vmem_chip = vmem_cap <= (64 << 20)
    single_step = rows_blk is not None and rows_blk >= rows
    big_input = rows * hw * itemsize >= _TWO_PASS_MIN_BYTES

    if rows_blk is None or (single_step and big_input and small_vmem_chip):
        out2 = _two_pass(x2, w, b, B, C, tile_budget, vmem_limit)
    else:
        out2 = _fused_call(x2, w, b, C, rows_blk, vmem_limit)
    return out2.reshape(B, C, H, W)


def eca_attention_ref(x, conv_w, conv_b):
    """Pure-JAX reference mirroring the PyTorch forward (f32 math)."""
    B, C, H, W = x.shape
    w = conv_w.reshape(-1).astype(jnp.float32)
    b = conv_b.reshape(-1).astype(jnp.float32)
    gap = jnp.mean(x.astype(jnp.float32), axis=(2, 3))           # (B, C)
    padded = jnp.pad(gap, ((0, 0), (_PAD, _PAD)))
    y = b[0] + sum(w[k] * padded[:, k:k + C] for k in range(KERNEL_SIZE))
    y = jax.nn.sigmoid(y)
    return x.astype(jnp.float32) * y[:, :, None, None]


if __name__ == "__main__":
    key = jax.random.PRNGKey(0)
    kx, kw, kb = jax.random.split(key, 3)

    # Small shapes consistent with the module: NCHW input.
    B, C, H, W = 2, 4, 16, 16
    x = jax.random.normal(kx, (B, C, H, W), dtype=jnp.float32)
    conv_w = 0.1 * jax.random.normal(kw, (KERNEL_SIZE,), dtype=jnp.float32)
    conv_b = 0.05 * jax.random.normal(kb, (1,), dtype=jnp.float32)

    ref = eca_attention_ref(x, conv_w, conv_b)

    # Fused single-pass path, f32 I/O.
    out = jax.block_until_ready(eca_attention(x, conv_w, conv_b))
    assert out.shape == (B, C, H, W) and out.dtype == x.dtype
    assert jnp.allclose(out, ref, atol=1e-5, rtol=1e-5)

    # bf16 I/O (halves HBM traffic; f32 accumulation/multiply inside).
    x_bf16 = x.astype(jnp.bfloat16)
    out_bf16 = jax.block_until_ready(eca_attention(x_bf16, conv_w, conv_b))
    ref_bf16 = eca_attention_ref(x_bf16.astype(jnp.float32), conv_w, conv_b)
    assert out_bf16.dtype == jnp.bfloat16
    assert jnp.allclose(out_bf16.astype(jnp.float32), ref_bf16, atol=3e-2, rtol=3e-2)

    # Exercise the tiled two-pass fallback (used for very large feature maps)
    # with an artificially small budget so the spatial axis gets blocked too.
    x2 = x.reshape(B * C, H * W)
    out_tp = _two_pass(x2, conv_w.astype(jnp.float32), conv_b.astype(jnp.float32),
                       B, C, tile_budget=16 * 1024, vmem_limit=32 << 20)
    out_tp = jax.block_until_ready(out_tp).reshape(B, C, H, W)
    assert jnp.allclose(out_tp, ref, atol=1e-5, rtol=1e-5)

    print("KERNEL_OK")
</pallas_src>

<mosaic_0001>
module attributes {stable_mosaic.version = 11 : i64} {
  func.func @_eca_fused_kernel(%arg0: i32, %arg1: memref<3xf32, #tpu.memory_space<smem>>, %arg2: memref<1xf32, #tpu.memory_space<smem>>, %arg3: memref<8x256xf32, #tpu.memory_space<vmem>>, %arg4: memref<8x256xf32, #tpu.memory_space<vmem>>) attributes {dimension_semantics = [#tpu.dimension_semantics<parallel>], iteration_bounds = array<i64: 1>, scalar_prefetch = 0 : i64, scratch_operands = 0 : i64, tpu.core_type = #tpu.core_type<tc>, window_params = [{transform_indices = @transform_0, window_bounds = array<i64: 3>}, {transform_indices = @transform_1, window_bounds = array<i64: 1>}, {transform_indices = @transform_2, window_bounds = array<i64: 8, 256>}, {transform_indices = @transform_3, window_bounds = array<i64: 8, 256>}]} {
    %c0 = arith.constant 0 : index
    %c0_0 = arith.constant 0 : index
    %0 = vector.load %arg3[%c0, %c0_0] : memref<8x256xf32, #tpu.memory_space<vmem>>, vector<8x256xf32>
    %cst = arith.constant dense<0.000000e+00> : vector<8xf32>
    %1 = vector.multi_reduction <add>, %0, %cst [1] : vector<8x256xf32> to vector<8xf32>
    %2 = vector.shape_cast %1 : vector<8xf32> to vector<8x1xf32>
    %cst_1 = arith.constant 3.906250e-03 : f32
    %3 = vector.broadcast %cst_1 : f32 to vector<8x1xf32>
    %4 = arith.mulf %2, %3 : vector<8x1xf32>
    %5 = tpu.iota {dimensions = array<i32: 0>} : vector<8x1xi32>
    %c4_i32 = arith.constant 4 : i32
    %c0_i32 = arith.constant 0 : i32
    %6 = arith.cmpi eq, %c4_i32, %c0_i32 : i32
    %c1_i32 = arith.constant 1 : i32
    %7 = arith.select %6, %c1_i32, %c4_i32 : i32
    %8 = vector.broadcast %7 : i32 to vector<8x1xi32>
    %9 = arith.remsi %5, %8 : vector<8x1xi32>
    %c0_i32_2 = arith.constant 0 : i32
    %10 = vector.broadcast %c0_i32_2 : i32 to vector<8x1xi32>
    %11 = arith.cmpi ne, %9, %10 : vector<8x1xi32>
    %c0_i32_3 = arith.constant 0 : i32
    %12 = vector.broadcast %c0_i32_3 : i32 to vector<8x1xi32>
    %13 = arith.cmpi slt, %9, %12 : vector<8x1xi32>
    %c0_i32_4 = arith.constant 0 : i32
    %14 = arith.cmpi slt, %7, %c0_i32_4 : i32
    %15 = vector.broadcast %14 : i1 to vector<8x1xi1>
    %16 = vector.broadcast %15 : vector<8x1xi1> to vector<8x1xi1>
    %17 = arith.xori %13, %16 : vector<8x1xi1>
    %18 = arith.andi %17, %11 : vector<8x1xi1>
    %19 = vector.broadcast %7 : i32 to vector<8x1xi32>
    %20 = arith.addi %9, %19 : vector<8x1xi32>
    %21 = arith.select %18, %20, %9 : vector<8x1xi1>, vector<8x1xi32>
    %cst_5 = arith.constant 0.000000e+00 : f32
    %22 = vector.broadcast %cst_5 : f32 to vector<1x1xf32>
    %23 = tpu.concatenate %22, %4, %22 in 0 : vector<1x1xf32>, vector<8x1xf32>, vector<1x1xf32> -> vector<10x1xf32>
    %c0_6 = arith.constant 0 : index
    %24 = memref.load %arg2[%c0_6] : memref<1xf32, #tpu.memory_space<smem>>
    %25 = vector.broadcast %24 : f32 to vector<8x1xf32>
    %26 = vector.extract_strided_slice %23 {offsets = [0, 0], sizes = [8, 1], strides = [1, 1]} : vector<10x1xf32> to vector<8x1xf32>
    %c-1_i32 = arith.constant -1 : i32
    %27 = vector.broadcast %c-1_i32 : i32 to vector<8x1xi32>
    %28 = arith.addi %21, %27 : vector<8x1xi32>
    %c0_i32_7 = arith.constant 0 : i32
    %29 = vector.broadcast %c0_i32_7 : i32 to vector<8x1xi32>
    %30 = arith.cmpi sge, %28, %29 : vector<8x1xi32>
    %c-1_i32_8 = arith.constant -1 : i32
    %31 = vector.broadcast %c-1_i32_8 : i32 to vector<8x1xi32>
    %32 = arith.addi %21, %31 : vector<8x1xi32>
    %c4_i32_9 = arith.constant 4 : i32
    %33 = vector.broadcast %c4_i32_9 : i32 to vector<8x1xi32>
    %34 = arith.cmpi slt, %32, %33 : vector<8x1xi32>
    %35 = arith.andi %30, %34 : vector<8x1xi1>
    %c0_10 = arith.constant 0 : index
    %36 = memref.load %arg1[%c0_10] : memref<3xf32, #tpu.memory_space<smem>>
    %cst_11 = arith.constant 0.000000e+00 : f32
    %37 = vector.broadcast %cst_11 : f32 to vector<8x1xf32>
    %38 = arith.select %35, %26, %37 : vector<8x1xi1>, vector<8x1xf32>
    %39 = vector.broadcast %36 : f32 to vector<8x1xf32>
    %40 = arith.mulf %39, %38 : vector<8x1xf32>
    %41 = arith.addf %25, %40 : vector<8x1xf32>
    %42 = vector.extract_strided_slice %23 {offsets = [1, 0], sizes = [8, 1], strides = [1, 1]} : vector<10x1xf32> to vector<8x1xf32>
    %c0_i32_12 = arith.constant 0 : i32
    %43 = vector.broadcast %c0_i32_12 : i32 to vector<8x1xi32>
    %44 = arith.addi %21, %43 : vector<8x1xi32>
    %c0_i32_13 = arith.constant 0 : i32
    %45 = vector.broadcast %c0_i32_13 : i32 to vector<8x1xi32>
    %46 = arith.cmpi sge, %44, %45 : vector<8x1xi32>
    %c0_i32_14 = arith.constant 0 : i32
    %47 = vector.broadcast %c0_i32_14 : i32 to vector<8x1xi32>
    %48 = arith.addi %21, %47 : vector<8x1xi32>
    %c4_i32_15 = arith.constant 4 : i32
    %49 = vector.broadcast %c4_i32_15 : i32 to vector<8x1xi32>
    %50 = arith.cmpi slt, %48, %49 : vector<8x1xi32>
    %51 = arith.andi %46, %50 : vector<8x1xi1>
    %c1 = arith.constant 1 : index
    %52 = memref.load %arg1[%c1] : memref<3xf32, #tpu.memory_space<smem>>
    %cst_16 = arith.constant 0.000000e+00 : f32
    %53 = vector.broadcast %cst_16 : f32 to vector<8x1xf32>
    %54 = arith.select %51, %42, %53 : vector<8x1xi1>, vector<8x1xf32>
    %55 = vector.broadcast %52 : f32 to vector<8x1xf32>
    %56 = arith.mulf %55, %54 : vector<8x1xf32>
    %57 = arith.addf %41, %56 : vector<8x1xf32>
    %58 = vector.extract_strided_slice %23 {offsets = [2, 0], sizes = [8, 1], strides = [1, 1]} : vector<10x1xf32> to vector<8x1xf32>
    %c1_i32_17 = arith.constant 1 : i32
    %59 = vector.broadcast %c1_i32_17 : i32 to vector<8x1xi32>
    %60 = arith.addi %21, %59 : vector<8x1xi32>
    %c0_i32_18 = arith.constant 0 : i32
    %61 = vector.broadcast %c0_i32_18 : i32 to vector<8x1xi32>
    %62 = arith.cmpi sge, %60, %61 : vector<8x1xi32>
    %c1_i32_19 = arith.constant 1 : i32
    %63 = vector.broadcast %c1_i32_19 : i32 to vector<8x1xi32>
    %64 = arith.addi %21, %63 : vector<8x1xi32>
    %c4_i32_20 = arith.constant 4 : i32
    %65 = vector.broadcast %c4_i32_20 : i32 to vector<8x1xi32>
    %66 = arith.cmpi slt, %64, %65 : vector<8x1xi32>
    %67 = arith.andi %62, %66 : vector<8x1xi1>
    %c2 = arith.constant 2 : index
    %68 = memref.load %arg1[%c2] : memref<3xf32, #tpu.memory_space<smem>>
    %cst_21 = arith.constant 0.000000e+00 : f32
    %69 = vector.broadcast %cst_21 : f32 to vector<8x1xf32>
    %70 = arith.select %67, %58, %69 : vector<8x1xi1>, vector<8x1xf32>
    %71 = vector.broadcast %68 : f32 to vector<8x1xf32>
    %72 = arith.mulf %71, %70 : vector<8x1xf32>
    %73 = arith.addf %57, %72 : vector<8x1xf32>
    %74 = arith.negf %73 : vector<8x1xf32>
    %75 = math.exp %74 : vector<8x1xf32>
    %cst_22 = arith.constant 1.000000e+00 : f32
    %76 = vector.broadcast %cst_22 : f32 to vector<8x1xf32>
    %77 = arith.addf %76, %75 : vector<8x1xf32>
    %78 = arith.divf %76, %77 : vector<8x1xf32>
    %c0_23 = arith.constant 0 : index
    %c0_24 = arith.constant 0 : index
    %79 = vector.load %arg3[%c0_23, %c0_24] : memref<8x256xf32, #tpu.memory_space<vmem>>, vector<8x256xf32>
    %80 = vector.broadcast %78 : vector<8x1xf32> to vector<8x256xf32>
    %81 = arith.mulf %79, %80 : vector<8x256xf32>
    %c0_25 = arith.constant 0 : index
    %c0_26 = arith.constant 0 : index
    %82 = vector.load %arg4[%c0_25, %c0_26] : memref<8x256xf32, #tpu.memory_space<vmem>>, vector<8x256xf32>
    tpu.vector_store %arg4[%c0_25, %c0_26], %81 {strides = array<i32>} : memref<8x256xf32, #tpu.memory_space<vmem>>, vector<8x256xf32>,
    return
  }
  func.func @transform_0(%arg0: i32) -> i32 {
    %c0_i32 = arith.constant 0 : i32
    %c0_i32_0 = arith.constant 0 : i32
    return %c0_i32 : i32
  }
  func.func @transform_1(%arg0: i32) -> i32 {
    %c0_i32 = arith.constant 0 : i32
    %c0_i32_0 = arith.constant 0 : i32
    return %c0_i32 : i32
  }
  func.func @transform_2(%arg0: i32) -> (i32, i32) {
    %c0_i32 = arith.constant 0 : i32
    %c0_i32_0 = arith.constant 0 : i32
    return %arg0, %c0_i32 : i32, i32
  }
  func.func @transform_3(%arg0: i32) -> (i32, i32) {
    %c0_i32 = arith.constant 0 : i32
    %c0_i32_0 = arith.constant 0 : i32
    return %arg0, %c0_i32 : i32, i32
  }
}

</mosaic_0001>

<bundles_post_ra>
// kernel: tpu_custom_call.1
= control target key start
LH: loop header
LB: loop body
LE: loop exit
PB: predicated region body
PF: predicated region fallthrough
CT: control target
= control target key end

     0   :  { %9 = vsyncpa [#allocation6], 0  ;;  %s266_s0 = inlined_call_operand.vmem [shape: f32[3], index: 0, kind: input, shape index: {}]   ;;  %s267_s1 = inlined_call_operand.<no memory space> [shape: f32[1], index: 1, kind: input, shape index: {}]   ;;  %s268_s2 = inlined_call_operand.hbm [shape: f32[8,256], index: 2, kind: input, shape index: {}]   ;;  %s269_s3 = inlined_call_operand.hbm [shape: f32[8,256], index: 3, kind: output, shape index: {}]  }
   0x1   :  { %10 = vsyncpa [#allocation4], 0 }
   0x2   :  { %11 = vsyncpa [#allocation5], 0  ;;  %s18_s14 = sshll.u32 %s266_s0, 4  ;;  %s19_s14 = int_to_ptr.vmem [resolvable:$true] %s18_s14 }
   0x3   :  { %s150_s15 = scalar_lea.vmem %s19_s14, 16  ;;  %p155_p1 = scmp.lt.s32.totalorder %s19_s14, %s19_s14 }
   0x4   :  { %p151_p0 = scmp.ne.s32.totalorder %s19_s14, %s150_s15  ;;  %p156_p2 = scmp.lt.s32.totalorder %s150_s15, %s150_s15 }
   0x6   :  { %p157_p3 = por %p156_p2, %p155_p1 }
   0x8   :  { %p158_p4 = pnand %p157_p3, %p151_p0 }
   0xa   :  { %161 = shalt.err (!%p158_p4)
}
   0xb   :  { %s212_s16 = smov [#allocation3]   ;;  %s213_s17 = smov [#allocation7]  }
   0xc   :  { %21 = dma.vmem_to_smem %s19_s14, 16, %s212_s16, [#allocation6]  }
   0xd   :  { %s30_s18 = sshll.u32 %s213_s17, 4  ;;  %s162_s21 = scalar_lea.hbm %s268_s2, 256  ;;  %s31_s18 = int_to_ptr.vmem [resolvable:$true] %s30_s18 }
   0xe   :  { %p163_p5 = scmp.ne.s32.totalorder %s268_s2, %s162_s21  ;;  %p166_p6 = scmp.lt.u32.totalorder %s162_s21, %s268_s2 }
  0x10   :  { %p168_p7 = pnand %p166_p6, %p163_p5 }
  0x12   :  { %171 = shalt.err (!%p168_p7)
}
  0x13   :  { %s172_s25 = scalar_lea.vmem %s31_s18, 256  ;;  %p177_p9 = scmp.lt.s32.totalorder %s31_s18, %s31_s18 }
  0x14   :  { %p173_p8 = scmp.ne.s32.totalorder %s31_s18, %s172_s25  ;;  %p178_p10 = scmp.lt.s32.totalorder %s172_s25, %s172_s25 }
  0x16   :  { %p179_p11 = por %p178_p10, %p177_p9 }
  0x18   :  { %p180_p12 = pnand %p179_p11, %p173_p8 }
  0x1a   :  { %183 = shalt.err (!%p180_p12)
}
  0x1b   :  { %33 = dma.hbm_to_vmem [thread:$0]  %s268_s2, 256, %s31_s18, [#allocation4]  }
  0x1c   :  { %206 = dma.done.wait [#allocation6], 16  }
  0x1d   :  { %207 = vsyncadd [#allocation6], 4294967280 }
  0x1e   :  { %208 = dma.done.wait [#allocation4], 256  }
  0x1f   :  { %209 = vsyncadd [#allocation4], 4294967040 }
  0x20   :  { %40 = sfence }
  0x21   :  { %v41_v0 = vld [vmem:[#allocation7] sm:$0xff]  ;;  %v42_v1 = vld [vmem:[#allocation7 + $0x8] sm:$0xff]  ;;  %v214_v3 = vmov 0   ;;  %v47_v4 = vlaneseq  ;;  %s73_s28 = sld [smem:[#allocation3]]  ;;  %s138_s29 = sld [smem:[#allocation3 + $0x1]]  ;;  %vm64_vm0 = vcmask 1040384   ;;  %v68_v12 = vstv %s267_s1 }
  0x22   :  { %v43_v2 = vadd.f32 %v42_v1, %v41_v0  ;;  %145 = vset.pattern.permute.xlu0 %v214_v3  ;;  %s139_s30 = sld [smem:[#allocation3 + $0x2]]  ;;  %vm84_vm2 = vcmask 1046528   ;;  %vm98_vm3 = vcmask 1045504   ;;  %s215_s1 = smov [#allocation8]  }
  0x23   :  { %v48_v5 = vshrl.u32 %v47_v4, 7  ;;  %s128_s5 = sshll.u32 %s215_s1, 4  ;;  %s129_s5 = int_to_ptr.vmem [resolvable:$true] %s128_s5 }
  0x24   :  { %44 = vadd.xlane.f32.xlu0 %v43_v2  ;;  %s184_s6 = scalar_lea.vmem %s129_s5, 256  ;;  %p189_p0 = scmp.lt.s32.totalorder %s129_s5, %s129_s5 }
  0x25   :  { %v53_v6 = vand.u32 3, %v48_v5  ;;  %p185_p13 = scmp.ne.s32.totalorder %s129_s5, %s184_s6  ;;  %p190_p1 = scmp.lt.s32.totalorder %s184_s6, %s184_s6 }
  0x27   :  { %v69_v7 = vadd.s32 4294967295, %v53_v6  ;;  %v93_v10 = vadd.s32 1, %v53_v6  ;;  %v75_v13 = vstv %s73_s28  ;;  %v90_v14 = vstv %s138_s29  ;;  %p191_p2 = por %p190_p1, %p189_p0 }
  0x28   :  { %v104_v23 = vstv %s139_s30 }
  0x29   :  { %vm70_vm1 = vcmp.ge.s32.totalorder %v69_v7, 0  ;;  %vm95_vm4 = vcmp.lt.s32.totalorder %v93_v10, 4  ;;  %p192_p3 = pnand %p191_p2, %p185_p13 }
  0xb1   :  { %v45_v8 = vpop.xlane.xlu0 %44 }
  0xb2   :  { %v46_v9 = vmul.f32 0.00390625, %v45_v8 }
  0xb4   :  { %v62_v11 = vrot.slane %v46_v9, 7 }
  0xb6   :  { %v65_v15 = vsel %vm64_vm0, 0.0, %v62_v11  ;;  %v66_v16 = vsel %vm64_vm0, %v62_v11, 0.0 }
  0xb7   :  { %v74_v17 = vsel %vm70_vm1, %v65_v15, 0.0  ;;  %v85_v18 = vrot.slane %v65_v15, 1  ;;  %v86_v19 = vrot.slane %v66_v16, 1  ;;  %v99_v20 = vrot.slane %v65_v15, 2 }
  0xb8   :  { %v76_v21 = vmul.f32 %v75_v13, %v74_v17  ;;  %v100_v22 = vrot.slane %v66_v16, 2 }
  0xb9   :  { %v87_v24 = vsel %vm84_vm2, %v85_v18, %v86_v19 }
  0xba   :  { %v77_v25 = vadd.f32 %v76_v21, %v68_v12  ;;  %v91_v26 = vmul.f32 %v90_v14, %v87_v24  ;;  %v101_v27 = vsel %vm98_vm3, %v99_v20, %v100_v22 }
  0xbb   :  { %v103_v28 = vsel %vm95_vm4, %v101_v27, 0.0 }
  0xbc   :  { %v92_v29 = vadd.f32 %v91_v26, %v77_v25  ;;  %v105_v30 = vmul.f32 %v104_v23, %v103_v28 }
  0xbe   :  { %v106_v31 = vadd.f32 %v105_v30, %v92_v29 }
  0xc0   :  { %v140_v32 = vmul.f32 -1.442695, %v106_v31 }
  0xc2   :  { %146 = vpow2.f32 %v140_v32 }
  0xcc   :  { %v147_v33 = vpop.eup %146 }
  0xcd   :  { %v110_v34 = vadd.f32 1.0, %v147_v33 }
  0xcf   :  { %148 = vrcp.f32 %v110_v34 }
  0xd9   :  { %v149_v35 = vpop.eup %148 }
  0xda   :  { %115 = vperm.xlu0 %145, %v149_v35  }
 0x159   :  { %v116_v36 = vpop.permute.xlu0 %115 }
 0x15a   :  { %v118_v37 = vmul.f32 %v116_v36, %v41_v0  ;;  %v119_v38 = vmul.f32 %v116_v36, %v42_v1 }
 0x15c   :  { %120 = vst [vmem:[#allocation8] sm:$0xff] %v118_v37  ;;  %121 = vst [vmem:[#allocation8 + $0x8] sm:$0xff] %v119_v38 }
 0x15d   :  { %195 = shalt.err (!%p192_p3)
}
 0x15e   :  { %s196_s9 = scalar_lea.hbm %s269_s3, 256 }
 0x15f   :  { %p197_p4 = scmp.ne.s32.totalorder %s269_s3, %s196_s9  ;;  %p200_p5 = scmp.lt.u32.totalorder %s196_s9, %s269_s3 }
 0x161   :  { %p202_p6 = pnand %p200_p5, %p197_p4 }
 0x163   :  { %205 = shalt.err (!%p202_p6)
}
 0x164   :  { %131 = dma.vmem_to_hbm [thread:$0]  %s129_s5, 256, %s269_s3, [#allocation5]  }
 0x165   :  { %210 = dma.done.wait [#allocation5], 256  }
 0x166   :  { %211 = vsyncadd [#allocation5], 4294967040 }
 0x167   :  { %135 = vsyncpa [#allocation4], 1 }
 0x168   :  { %136 = vsyncpa [#allocation5], 1 }
 0x169   :  { %137 = vsyncpa [#allocation6], 1 }

</bundles_post_ra>
